<compile_context>
chip_gen: v6e
topology: v6e:2x2x1
jax: 0.10.0
libtpu: 0.0.40
codegen_flags: <defaults>
</compile_context>

<pallas_src>
import numpy as np
import jax
import jax.numpy as jnp
from jax.experimental import pallas as pl
from jax.experimental.pallas import tpu as pltpu

_SQRT_HALF = 0.7071067811865476  # sqrt(0.5): 0.5*outer(d,d) == outer(s*d, s*d)


# ----------------------------------------------------------------------------
# Kernel 1: fused audio + image cov_matrix
#   torch: z = stack([x, y], 1); m = z - mean(z, 1); bmm(m^T, m)
#   here : outer(sqrt(0.5)*(x - y), sqrt(0.5)*(x - y))   (exact for 2 rows)
# ----------------------------------------------------------------------------
def _fused_cov_kernel(af_ref, imf_ref, ao_ref, io_ref):
    # af_ref / imf_ref: (B, 2, C) in VMEM;  ao_ref / io_ref: (B, C, C)
    B = af_ref.shape[0]
    for b in range(B):                         # B is tiny (static unroll)
        za = af_ref[b]                         # (2, C)
        zi = imf_ref[b]                        # (2, C)
        # scale the (1, C) difference, not the (C, C) result
        da = (za[0:1, :] - za[1:2, :]) * _SQRT_HALF   # (1, C)
        di = (zi[0:1, :] - zi[1:2, :]) * _SQRT_HALF   # (1, C)
        # K=1 outer product on the MXU (no mean / concat / result-scale needed)
        ao_ref[b] = jnp.dot(da.T, da, preferred_element_type=jnp.float32)
        io_ref[b] = jnp.dot(di.T, di, preferred_element_type=jnp.float32)


def fused_correlations(audio_features, image_features):
    """audio/image features: (B, 2, C) -> two (B, C, C) covariance tensors.

    Single grid-less pallas_call: everything fits VMEM, so we pay the
    pipeline prologue / grid-step overhead exactly once for both correlations.
    """
    B, two, C = audio_features.shape
    assert two == 2
    return pl.pallas_call(
        _fused_cov_kernel,
        out_shape=(jax.ShapeDtypeStruct((B, C, C), jnp.float32),
                   jax.ShapeDtypeStruct((B, C, C), jnp.float32)),
    )(audio_features.astype(jnp.float32), image_features.astype(jnp.float32))


# ----------------------------------------------------------------------------
# Kernel 2: AntiAliasInterpolation2d as  out[c] = A @ x[c] @ B
#   A (Ho, H) and B (W, Wo) fold: zero pad + separable Gaussian + nearest ::step
# ----------------------------------------------------------------------------
def _gaussian_taps(scale):
    sigma = (1.0 / scale - 1.0) / 2.0
    kernel_size = 2 * round(sigma * 4) + 1
    ka = kernel_size // 2
    # kb = ka - 1 if even: dead branch (kernel_size is always odd) -- kept for fidelity
    kb = ka - 1 if kernel_size % 2 == 0 else ka
    mean = (kernel_size - 1) / 2.0
    g = np.exp(-((np.arange(kernel_size) - mean) ** 2) / (2.0 * sigma ** 2))
    g = g / g.sum()        # normalizing 1D g == normalizing outer(g, g)
    return g, ka, kb


def _blur_downsample_matrix(size, scale, g, ka):
    """Banded operator M (out, size): M[io, h] = g[h + ka - io*step] (0 outside),
    i.e. zero-padded separable Gaussian blur followed by nearest ::step pick."""
    step = int(round(1.0 / scale))
    out = int(size * scale)
    K = g.shape[0]
    M = np.zeros((out, size), np.float32)
    for io in range(out):
        for h in range(size):
            t = h + ka - io * step
            if 0 <= t < K:
                M[io, h] = g[t]
    return M, out


def anti_alias_interpolation2d(x, scale):
    """x: (N, C, H, W) float32 -> (N, C, H*scale, W*scale).
    Matches AntiAliasInterpolation2d (depthwise Gaussian blur + nearest down).
    NOTE: nearest selection as plain ::step matches F.interpolate(mode='nearest')
    only for scales that are exact reciprocals of integers (0.5, 0.25, ...)."""
    if scale == 1 or scale == 1.0:
        return x
    N, C, H, W = x.shape
    g, ka, _ = _gaussian_taps(scale)
    A_np, Ho = _blur_downsample_matrix(H, scale, g, ka)      # (Ho, H)
    Bt_np, Wo = _blur_downsample_matrix(W, scale, g, ka)     # (Wo, W)
    A = jnp.asarray(A_np, jnp.float32)                       # (Ho, H)
    Bm = jnp.asarray(Bt_np.T, jnp.float32)                   # (W, Wo)

    # Wrapper-side reshapes are free row-major relabels (no data movement):
    # pass the image as a (C*H, W) slab per batch element so the W-side
    # contraction is a single MXU matmul for all channels.
    x_flat = x.astype(jnp.float32).reshape(N, C * H, W)

    def blur_kernel(a_ref, x_ref, b_ref, o_ref):
        # a_ref: (Ho, H)  x_ref: (C*H, W)  b_ref: (W, Wo)  o_ref: (C*Ho, Wo)
        t = jnp.dot(x_ref[...], b_ref[...],
                    preferred_element_type=jnp.float32)      # (C*H, Wo)
        Am = a_ref[...]
        for c in range(C):                                    # C == 3 (RGB), static
            o_ref[c * Ho:(c + 1) * Ho, :] = jnp.dot(
                Am, t[c * H:(c + 1) * H, :],
                preferred_element_type=jnp.float32)           # (Ho, Wo)

    out_flat = pl.pallas_call(
        blur_kernel,
        out_shape=jax.ShapeDtypeStruct((N, C * Ho, Wo), jnp.float32),
        grid=(N,),
        in_specs=[
            pl.BlockSpec((Ho, H), lambda n: (0, 0)),
            pl.BlockSpec((None, C * H, W), lambda n: (n, 0, 0)),
            pl.BlockSpec((W, Wo), lambda n: (0, 0)),
        ],
        out_specs=pl.BlockSpec((None, C * Ho, Wo), lambda n: (n, 0, 0)),
        compiler_params=pltpu.CompilerParams(
            dimension_semantics=("parallel",)),   # independent images -> 2 TCs on v7x
    )(A, x_flat, Bm)
    return out_flat.reshape(N, C, Ho, Wo)


def image_pyramide(x, scales):
    """ImagePyramide.forward: dict of anti-aliased downscales of x (NCHW)."""
    out = {}
    for scale in scales:
        out['prediction_' + str(scale)] = anti_alias_interpolation2d(x, scale)
    return out


# ----------------------------------------------------------------------------
# AnimateModel.forward (implementable portion)
# ----------------------------------------------------------------------------
GEN_SCALES = (1, 0.5)
DISC_SCALES = (1,)


def animate_model_forward(x):
    # TODO(synk): kp_detector / mapping / he_estimator / keypoint_transformation /
    # OcclusionAwareSPADEGenerator / AudioEncoder / IResNet18 / ROI cropping have
    # no source provided; their outputs are represented by the stand-in feature
    # tensors below.
    generated = {}

    # is_cmtc branches: (B, 2, C) features -> (B, C, C) covariances, one fused call.
    af = x['audio_features']
    imf = x['image_features']
    audio_correlation, image_correlation = fused_correlations(af, imf)

    B = af.shape[0]
    generated['cor'] = audio_correlation
    generated['audio_correlation'] = audio_correlation.reshape(B, -1)
    generated['image_correlation'] = image_correlation.reshape(B, -1)

    # ImagePyramide modules built in __init__ (used by the training loss);
    # applied to the source image to exercise the blur/downsample kernel.
    generated['gen_pyramid'] = image_pyramide(x['source_image'], GEN_SCALES)
    generated['disc_pyramid'] = image_pyramide(x['source_image'], DISC_SCALES)
    return generated


# ----------------------------------------------------------------------------
if __name__ == "__main__":
    key = jax.random.PRNGKey(0)
    k1, k2, k3 = jax.random.split(key, 3)

    B, C = 2, 128                    # encoders emit 128-d features
    src = jax.random.uniform(k1, (2, 3, 16, 16), dtype=jnp.float32)   # NCHW image
    audio_features = jax.random.normal(k2, (B, 2, C), dtype=jnp.float32)
    image_features = jax.random.normal(k3, (B, 2, C), dtype=jnp.float32)

    x = {
        'source_image': src,
        'audio_features': audio_features,
        'image_features': image_features,
    }

    out = animate_model_forward(x)
    out = jax.block_until_ready(out)

    # --- reference: cov_matrix (mirrors the torch code exactly) ---
    def cov_ref(f):
        z = jnp.stack([f[:, 0], f[:, 1]], axis=1)
        m = z - jnp.mean(z, axis=1, keepdims=True)
        return jnp.einsum('bkc,bkd->bcd', m, m)

    assert jnp.allclose(out['cor'], cov_ref(audio_features), rtol=1e-5, atol=1e-4)
    assert jnp.allclose(out['image_correlation'].reshape(B, C, C),
                        cov_ref(image_features), rtol=1e-5, atol=1e-4)

    # --- reference: AntiAliasInterpolation2d (pad + 2D conv + nearest ::step) ---
    def blur_ref(xnp, scale):
        sigma = (1.0 / scale - 1.0) / 2.0
        K = 2 * round(sigma * 4) + 1
        ka = K // 2
        kb = ka
        mean = (K - 1) / 2.0
        g = np.exp(-((np.arange(K) - mean) ** 2) / (2.0 * sigma ** 2))
        taps = np.outer(g, g)
        taps = taps / taps.sum()
        Nr, Cr, Hr, Wr = xnp.shape
        xp = np.pad(xnp.astype(np.float64), ((0, 0), (0, 0), (ka, kb), (ka, kb)))
        full = np.zeros((Nr, Cr, Hr, Wr), np.float64)
        for di in range(K):
            for dj in range(K):
                full += taps[di, dj] * xp[:, :, di:di + Hr, dj:dj + Wr]
        step = int(round(1.0 / scale))
        Ho, Wo = int(Hr * scale), int(Wr * scale)
        return full[:, :, :Ho * step:step, :Wo * step:step]

    ref_half = blur_ref(np.asarray(src), 0.5)
    assert np.allclose(np.asarray(out['gen_pyramid']['prediction_0.5']),
                       ref_half, rtol=1e-5, atol=1e-5)
    assert out['gen_pyramid']['prediction_1'].shape == (2, 3, 16, 16)
    assert out['gen_pyramid']['prediction_0.5'].shape == (2, 3, 8, 8)
    assert out['disc_pyramid']['prediction_1'].shape == (2, 3, 16, 16)

    print("KERNEL_OK")
</pallas_src>

<mosaic_0001>
module attributes {stable_mosaic.version = 11 : i64} {
  func.func @_fused_cov_kernel(%arg0: memref<2x2x128xf32, #tpu.memory_space<vmem>>, %arg1: memref<2x2x128xf32, #tpu.memory_space<vmem>>, %arg2: memref<2x128x128xf32, #tpu.memory_space<vmem>>, %arg3: memref<2x128x128xf32, #tpu.memory_space<vmem>>) attributes {dimension_semantics = [], scalar_prefetch = 0 : i64, scratch_operands = 0 : i64, tpu.core_type = #tpu.core_type<tc>} {
    %c0 = arith.constant 0 : index
    %c0_0 = arith.constant 0 : index
    %c0_1 = arith.constant 0 : index
    %0 = vector.load %arg0[%c0, %c0_0, %c0_1] : memref<2x2x128xf32, #tpu.memory_space<vmem>>, vector<1x2x128xf32>
    %1 = vector.shape_cast %0 : vector<1x2x128xf32> to vector<2x128xf32>
    %c0_2 = arith.constant 0 : index
    %c0_3 = arith.constant 0 : index
    %c0_4 = arith.constant 0 : index
    %2 = vector.load %arg1[%c0_2, %c0_3, %c0_4] : memref<2x2x128xf32, #tpu.memory_space<vmem>>, vector<1x2x128xf32>
    %3 = vector.shape_cast %2 : vector<1x2x128xf32> to vector<2x128xf32>
    %4 = vector.extract_strided_slice %1 {offsets = [0, 0], sizes = [1, 128], strides = [1, 1]} : vector<2x128xf32> to vector<1x128xf32>
    %5 = vector.extract_strided_slice %1 {offsets = [1, 0], sizes = [1, 128], strides = [1, 1]} : vector<2x128xf32> to vector<1x128xf32>
    %6 = arith.subf %4, %5 : vector<1x128xf32>
    %cst = arith.constant 0.707106769 : f32
    %7 = vector.broadcast %cst : f32 to vector<1x128xf32>
    %8 = arith.mulf %6, %7 : vector<1x128xf32>
    %9 = vector.extract_strided_slice %3 {offsets = [0, 0], sizes = [1, 128], strides = [1, 1]} : vector<2x128xf32> to vector<1x128xf32>
    %10 = vector.extract_strided_slice %3 {offsets = [1, 0], sizes = [1, 128], strides = [1, 1]} : vector<2x128xf32> to vector<1x128xf32>
    %11 = arith.subf %9, %10 : vector<1x128xf32>
    %cst_5 = arith.constant 0.707106769 : f32
    %12 = vector.broadcast %cst_5 : f32 to vector<1x128xf32>
    %13 = arith.mulf %11, %12 : vector<1x128xf32>
    %14 = tpu.transpose %8, [1, 0] : vector<1x128xf32> -> vector<128x1xf32>
    %cst_6 = arith.constant dense<0.000000e+00> : vector<128x128xf32>
    %15 = tpu.matmul %14, %8, %cst_6 {dimension_numbers = #tpu.dot_dimension_numbers<[1], [0], [0], [1], [0, 0, 1, 1], [], []>} : vector<128x1xf32>, vector<1x128xf32>, vector<128x128xf32> -> vector<128x128xf32>
    %c0_7 = arith.constant 0 : index
    %c0_8 = arith.constant 0 : index
    %c0_9 = arith.constant 0 : index
    %16 = vector.load %arg2[%c0_7, %c0_8, %c0_9] : memref<2x128x128xf32, #tpu.memory_space<vmem>>, vector<1x128x128xf32>
    %17 = vector.shape_cast %16 : vector<1x128x128xf32> to vector<128x128xf32>
    %18 = vector.shape_cast %15 : vector<128x128xf32> to vector<1x128x128xf32>
    tpu.vector_store %arg2[%c0_7, %c0_8, %c0_9], %18 {strides = array<i32>} : memref<2x128x128xf32, #tpu.memory_space<vmem>>, vector<1x128x128xf32>,
    %19 = tpu.transpose %13, [1, 0] : vector<1x128xf32> -> vector<128x1xf32>
    %cst_10 = arith.constant dense<0.000000e+00> : vector<128x128xf32>
    %20 = tpu.matmul %19, %13, %cst_10 {dimension_numbers = #tpu.dot_dimension_numbers<[1], [0], [0], [1], [0, 0, 1, 1], [], []>} : vector<128x1xf32>, vector<1x128xf32>, vector<128x128xf32> -> vector<128x128xf32>
    %c0_11 = arith.constant 0 : index
    %c0_12 = arith.constant 0 : index
    %c0_13 = arith.constant 0 : index
    %21 = vector.load %arg3[%c0_11, %c0_12, %c0_13] : memref<2x128x128xf32, #tpu.memory_space<vmem>>, vector<1x128x128xf32>
    %22 = vector.shape_cast %21 : vector<1x128x128xf32> to vector<128x128xf32>
    %23 = vector.shape_cast %20 : vector<128x128xf32> to vector<1x128x128xf32>
    tpu.vector_store %arg3[%c0_11, %c0_12, %c0_13], %23 {strides = array<i32>} : memref<2x128x128xf32, #tpu.memory_space<vmem>>, vector<1x128x128xf32>,
    %c1 = arith.constant 1 : index
    %c0_14 = arith.constant 0 : index
    %c0_15 = arith.constant 0 : index
    %24 = vector.load %arg0[%c1, %c0_14, %c0_15] : memref<2x2x128xf32, #tpu.memory_space<vmem>>, vector<1x2x128xf32>
    %25 = vector.shape_cast %24 : vector<1x2x128xf32> to vector<2x128xf32>
    %c1_16 = arith.constant 1 : index
    %c0_17 = arith.constant 0 : index
    %c0_18 = arith.constant 0 : index
    %26 = vector.load %arg1[%c1_16, %c0_17, %c0_18] : memref<2x2x128xf32, #tpu.memory_space<vmem>>, vector<1x2x128xf32>
    %27 = vector.shape_cast %26 : vector<1x2x128xf32> to vector<2x128xf32>
    %28 = vector.extract_strided_slice %25 {offsets = [0, 0], sizes = [1, 128], strides = [1, 1]} : vector<2x128xf32> to vector<1x128xf32>
    %29 = vector.extract_strided_slice %25 {offsets = [1, 0], sizes = [1, 128], strides = [1, 1]} : vector<2x128xf32> to vector<1x128xf32>
    %30 = arith.subf %28, %29 : vector<1x128xf32>
    %cst_19 = arith.constant 0.707106769 : f32
    %31 = vector.broadcast %cst_19 : f32 to vector<1x128xf32>
    %32 = arith.mulf %30, %31 : vector<1x128xf32>
    %33 = vector.extract_strided_slice %27 {offsets = [0, 0], sizes = [1, 128], strides = [1, 1]} : vector<2x128xf32> to vector<1x128xf32>
    %34 = vector.extract_strided_slice %27 {offsets = [1, 0], sizes = [1, 128], strides = [1, 1]} : vector<2x128xf32> to vector<1x128xf32>
    %35 = arith.subf %33, %34 : vector<1x128xf32>
    %cst_20 = arith.constant 0.707106769 : f32
    %36 = vector.broadcast %cst_20 : f32 to vector<1x128xf32>
    %37 = arith.mulf %35, %36 : vector<1x128xf32>
    %38 = tpu.transpose %32, [1, 0] : vector<1x128xf32> -> vector<128x1xf32>
    %cst_21 = arith.constant dense<0.000000e+00> : vector<128x128xf32>
    %39 = tpu.matmul %38, %32, %cst_21 {dimension_numbers = #tpu.dot_dimension_numbers<[1], [0], [0], [1], [0, 0, 1, 1], [], []>} : vector<128x1xf32>, vector<1x128xf32>, vector<128x128xf32> -> vector<128x128xf32>
    %c1_22 = arith.constant 1 : index
    %c0_23 = arith.constant 0 : index
    %c0_24 = arith.constant 0 : index
    %40 = vector.load %arg2[%c1_22, %c0_23, %c0_24] : memref<2x128x128xf32, #tpu.memory_space<vmem>>, vector<1x128x128xf32>
    %41 = vector.shape_cast %40 : vector<1x128x128xf32> to vector<128x128xf32>
    %42 = vector.shape_cast %39 : vector<128x128xf32> to vector<1x128x128xf32>
    tpu.vector_store %arg2[%c1_22, %c0_23, %c0_24], %42 {strides = array<i32>} : memref<2x128x128xf32, #tpu.memory_space<vmem>>, vector<1x128x128xf32>,
    %43 = tpu.transpose %37, [1, 0] : vector<1x128xf32> -> vector<128x1xf32>
    %cst_25 = arith.constant dense<0.000000e+00> : vector<128x128xf32>
    %44 = tpu.matmul %43, %37, %cst_25 {dimension_numbers = #tpu.dot_dimension_numbers<[1], [0], [0], [1], [0, 0, 1, 1], [], []>} : vector<128x1xf32>, vector<1x128xf32>, vector<128x128xf32> -> vector<128x128xf32>
    %c1_26 = arith.constant 1 : index
    %c0_27 = arith.constant 0 : index
    %c0_28 = arith.constant 0 : index
    %45 = vector.load %arg3[%c1_26, %c0_27, %c0_28] : memref<2x128x128xf32, #tpu.memory_space<vmem>>, vector<1x128x128xf32>
    %46 = vector.shape_cast %45 : vector<1x128x128xf32> to vector<128x128xf32>
    %47 = vector.shape_cast %44 : vector<128x128xf32> to vector<1x128x128xf32>
    tpu.vector_store %arg3[%c1_26, %c0_27, %c0_28], %47 {strides = array<i32>} : memref<2x128x128xf32, #tpu.memory_space<vmem>>, vector<1x128x128xf32>,
    return
  }
}

</mosaic_0001>

<bundles_post_ra>
// kernel: tpu_custom_call.1
= control target key start
LH: loop header
LB: loop body
LE: loop exit
PB: predicated region body
PF: predicated region fallthrough
CT: control target
= control target key end

     0   :  { %9 = vsyncpa [#allocation3], 0  ;;  %s1543_s0 = inlined_call_operand.hbm [shape: f32[2,2,128], index: 0, kind: input, shape index: {}]   ;;  %s1544_s1 = inlined_call_operand.hbm [shape: f32[2,2,128], index: 1, kind: input, shape index: {}]   ;;  %s1545_s2 = inlined_call_operand.hbm [shape: f32[2,128,128], index: 2, kind: output, shape index: {0}]   ;;  %s1546_s3 = inlined_call_operand.hbm [shape: f32[2,128,128], index: 3, kind: output, shape index: {1}]  }
   0x1   :  { %10 = vsyncpa [#allocation6], 0 }
   0x2   :  { %11 = vsyncpa [#allocation4], 0 }
   0x3   :  { %12 = vsyncpa [#allocation9], 0  ;;  %s1420_s12 = smov [#allocation2]  }
   0x4   :  { %s18_s13 = sshll.u32 %s1420_s12, 4  ;;  %s19_s13 = int_to_ptr.vmem [resolvable:$true] %s18_s13 }
   0x5   :  { %s1340_s14 = scalar_lea.vmem %s19_s13, 64  ;;  %p1345_p1 = scmp.lt.s32.totalorder %s19_s13, %s19_s13 }
   0x6   :  { %p1341_p0 = scmp.ne.s32.totalorder %s19_s13, %s1340_s14  ;;  %p1346_p2 = scmp.lt.s32.totalorder %s1340_s14, %s1340_s14 }
   0x8   :  { %p1347_p3 = por %p1346_p2, %p1345_p1 }
   0xa   :  { %p1348_p4 = pnand %p1347_p3, %p1341_p0 }
   0xc   :  { %1351 = shalt.err (!%p1348_p4)
}
   0xd   :  { %s1421_s15 = smov 32   ;;  %s1422_s16 = smov 2  }
   0xe   :  { %24 = dma.hbm_to_vmem [thread:$0]  %s1543_s0, 64, %s19_s13, [#allocation3], %s1421_s15, %s1421_s15, %s1422_s16  }
   0xf   :  { %s1423_s19 = smov [#allocation5]  }
  0x10   :  { %s30_s20 = sshll.u32 %s1423_s19, 4  ;;  %s31_s20 = int_to_ptr.vmem [resolvable:$true] %s30_s20 }
  0x11   :  { %s1360_s21 = scalar_lea.vmem %s31_s20, 64  ;;  %p1365_p6 = scmp.lt.s32.totalorder %s31_s20, %s31_s20 }
  0x12   :  { %p1361_p5 = scmp.ne.s32.totalorder %s31_s20, %s1360_s21  ;;  %p1366_p7 = scmp.lt.s32.totalorder %s1360_s21, %s1360_s21 }
  0x14   :  { %p1367_p8 = por %p1366_p7, %p1365_p6 }
  0x16   :  { %p1368_p9 = pnand %p1367_p8, %p1361_p5 }
  0x18   :  { %1371 = shalt.err (!%p1368_p9)
}
  0x19   :  { %36 = dma.hbm_to_vmem [thread:$0]  %s1544_s1, 64, %s31_s20, [#allocation6], %s1421_s15, %s1421_s15, %s1422_s16  }
  0x1a   :  { %1412 = dma.done.wait [#allocation3], 64  }
  0x1b   :  { %1413 = vsyncadd [#allocation3], 4294967232 }
  0x1c   :  { %1414 = dma.done.wait [#allocation6], 64  }
  0x1d   :  { %1415 = vsyncadd [#allocation6], 4294967232  ;;  %v43_v0 = vld [vmem:[#allocation2] sm:$0x3]  ;;  %v546_v1 = vld [vmem:[#allocation2 + $0x2] sm:$0x3] }
  0x1e   :  { %v44_v2 = vld [vmem:[#allocation5] sm:$0x3]  ;;  %v46_v3 = vrot.slane %v43_v0, 1  ;;  %v550_v4 = vrot.slane %v546_v1, 1  ;;  %v548_v6 = vld [vmem:[#allocation5 + $0x2] sm:$0x3] }
  0x1f   :  { %v51_v5 = vrot.slane %v44_v2, 1  ;;  %v555_v7 = vrot.slane %v548_v6, 1  ;;  %vm136_vm0 = vcmask 1040384   ;;  %vm87_vm1 = vcmask 7168   ;;  %s1424_s0 = smov [#allocation7]  }
  0x20   :  { %v48_v8 = vsub.f32 %v43_v0, %v46_v3  ;;  %v552_v9 = vsub.f32 %v546_v1, %v550_v4  ;;  %s1054_s1 = sshll.u32 %s1424_s0, 4  ;;  %s1055_s1 = int_to_ptr.vmem [resolvable:$true] %s1054_s1 }
  0x21   :  { %v53_v10 = vsub.f32 %v44_v2, %v51_v5  ;;  %v557_v11 = vsub.f32 %v548_v6, %v555_v7  ;;  %s1372_s24 = scalar_lea.vmem %s1055_s1, 4096  ;;  %p1377_p11 = scmp.lt.s32.totalorder %s1055_s1, %s1055_s1 }
  0x22   :  { %v49_v12 = vmul.f32 0.70710677, %v48_v8  ;;  %v553_v13 = vmul.f32 0.70710677, %v552_v9  ;;  %p1373_p10 = scmp.ne.s32.totalorder %s1055_s1, %s1372_s24  ;;  %p1378_p12 = scmp.lt.s32.totalorder %s1372_s24, %s1372_s24 }
  0x23   :  { %v54_v14 = vmul.f32 0.70710677, %v53_v10  ;;  %v1454_v15 = vmul.f32 0.70710677, %v557_v11 }
  0x24   :  { %55 = vxpose.xlu0.b32.start.end [1/1] (short) %v49_v12, 128  ;;  %559 = vxpose.xlu1.b32.start.end [1/1] (short) %v553_v13, 128  ;;  %p1379_p13 = por %p1378_p12, %p1377_p11 }
  0x25   :  { %1219 = vmatprep.subr.msk.mxu0 %vm136_vm0, %v49_v12  ;;  %1245 = vmatprep.subr.msk.mxu1 %vm136_vm0, %v54_v14 }
  0x26   :  { %1220 = vmatpush3.msk.msra.mxu0 %vm136_vm0, %v49_v12  ;;  %1246 = vmatpush3.msk.msra.mxu1 %vm136_vm0, %v54_v14  ;;  %p1380_p0 = pnand %p1379_p13, %p1373_p10 }
  0x27   :  { %1271 = vmatprep.subr.msk.mxu0 %vm136_vm0, %v553_v13  ;;  %1297 = vmatprep.subr.msk.mxu1 %vm136_vm0, %v1454_v15 }
  0x61   :  { %301 = vxpose.xlu0.b32.start.end [1/1] (short) %v54_v14, 128  ;;  %804 = vxpose.xlu1.b32.start.end [1/1] (short) %v1454_v15, 128 }
  0xa0   :  { %v71_v16 = vpop.trf.xlu0  ;;  %v575_v17 = vpop.trf.xlu1 }
  0xa1   :  { %1221 = vmatprep.mubr.msk.f32.mxu0 %vm87_vm1, %v71_v16 }
  0xa4   :  { %v72_v18 = vpop.trf.xlu0  ;;  %v576_v19 = vpop.trf.xlu1 }
  0xa5   :  { %1222 = vmatmul.mubr.msk.f32.vlgmr.msra.gmra.mxu0 %vm87_vm1, %v72_v18 }
  0xa6   :  { %1272 = vmatpush3.msk.msra.mxu0 %vm136_vm0, %v553_v13 }
  0xa8   :  { %v73_v20 = vpop.trf.xlu0  ;;  %v577_v21 = vpop.trf.xlu1 }
  0xa9   :  { %1224 = vmatprep.mubr.msk.f32.mxu0 %vm87_vm1, %v73_v20 }
  0xac   :  { %v74_v22 = vpop.trf.xlu0  ;;  %v578_v23 = vpop.trf.xlu1 }
  0xad   :  { %1225 = vmatmul.mubr.msk.f32.gmra.mxu0 %vm87_vm1, %v74_v22 }
  0xb0   :  { %v75_v24 = vpop.trf.xlu0  ;;  %v579_v25 = vpop.trf.xlu1 }
  0xb1   :  { %1227 = vmatprep.mubr.msk.f32.mxu0 %vm87_vm1, %v75_v24 }
  0xb4   :  { %v76_v26 = vpop.trf.xlu0  ;;  %v580_v27 = vpop.trf.xlu1 }
  0xb5   :  { %1228 = vmatmul.mubr.msk.f32.gmra.mxu0 %vm87_vm1, %v76_v26 }
  0xb8   :  { %v77_v28 = vpop.trf.xlu0  ;;  %v581_v29 = vpop.trf.xlu1 }
  0xb9   :  { %1230 = vmatprep.mubr.msk.f32.mxu0 %vm87_vm1, %v77_v28 }
  0xbc   :  { %v78_v30 = vpop.trf.xlu0  ;;  %v582_v31 = vpop.trf.xlu1 }
  0xbd   :  { %1231 = vmatmul.mubr.msk.f32.gmra.mxu0 %vm87_vm1, %v78_v30 }
  0xc0   :  { %v79_v32 = vpop.trf.xlu0  ;;  %v583_v33 = vpop.trf.xlu1 }
  0xc1   :  { %1233 = vmatprep.mubr.msk.f32.mxu0 %vm87_vm1, %v79_v32 }
  0xc4   :  { %v80_v34 = vpop.trf.xlu0  ;;  %v584_v35 = vpop.trf.xlu1 }
  0xc5   :  { %1234 = vmatmul.mubr.msk.f32.gmra.mxu0 %vm87_vm1, %v80_v34 }
  0xc8   :  { %v81_v36 = vpop.trf.xlu0  ;;  %v585_v37 = vpop.trf.xlu1 }
  0xc9   :  { %1236 = vmatprep.mubr.msk.f32.mxu0 %vm87_vm1, %v81_v36 }
  0xcc   :  { %v82_v38 = vpop.trf.xlu0  ;;  %v586_v39 = vpop.trf.xlu1 }
  0xcd   :  { %1237 = vmatmul.mubr.msk.f32.gmra.mxu0 %vm87_vm1, %v82_v38 }
  0xd0   :  { %v83_v40 = vpop.trf.xlu0  ;;  %v587_v41 = vpop.trf.xlu1 }
  0xd1   :  { %1239 = vmatprep.mubr.msk.f32.mxu0 %vm87_vm1, %v83_v40 }
  0xd4   :  { %v84_v42 = vpop.trf.xlu0  ;;  %v588_v43 = vpop.trf.xlu1 }
  0xd5   :  { %1240 = vmatmul.mubr.msk.f32.gmra.mxu0 %vm87_vm1, %v84_v42 }
  0xd8   :  { %v85_v44 = vpop.trf.xlu0  ;;  %v589_v45 = vpop.trf.xlu1 }
  0xd9   :  { %1242 = vmatprep.mubr.msk.f32.mxu0 %vm87_vm1, %v85_v44 }
  0xdc   :  { %v86_v46 = vpop.trf.xlu0  ;;  %v590_v47 = vpop.trf.xlu1 }
  0xdd   :  { %1243 = vmatmul.mubr.msk.f32.gmra.mxu0 %vm87_vm1, %v86_v46 }
  0xde   :  { %1273 = vmatprep.mubr.msk.f32.mxu0 %vm87_vm1, %v575_v17 }
  0xe0   :  { %v317_v48 = vpop.trf.xlu0  ;;  %v820_v49 = vpop.trf.xlu1 }
  0xe1   :  { %1247 = vmatprep.mubr.msk.f32.mxu1 %vm87_vm1, %v317_v48  ;;  %1274 = vmatmul.mubr.msk.f32.vlgmr.msra.gmra.mxu0 %vm87_vm1, %v576_v19 }
  0xe2   :  { %1276 = vmatprep.mubr.msk.f32.mxu0 %vm87_vm1, %v577_v21 }
  0xe4   :  { %v318_v50 = vpop.trf.xlu0  ;;  %v821_v51 = vpop.trf.xlu1 }
  0xe5   :  { %1248 = vmatmul.mubr.msk.f32.vlgmr.msra.gmra.mxu1 %vm87_vm1, %v318_v50  ;;  %1277 = vmatmul.mubr.msk.f32.gmra.mxu0 %vm87_vm1, %v578_v23 }
  0xe6   :  { %1279 = vmatprep.mubr.msk.f32.mxu0 %vm87_vm1, %v579_v25  ;;  %1298 = vmatpush3.msk.msra.mxu1 %vm136_vm0, %v1454_v15 }
  0xe8   :  { %v319_v52 = vpop.trf.xlu0  ;;  %v822_v54 = vpop.trf.xlu1 }
  0xe9   :  { %1250 = vmatprep.mubr.msk.f32.mxu1 %vm87_vm1, %v319_v52  ;;  %1280 = vmatmul.mubr.msk.f32.gmra.mxu0 %vm87_vm1, %v580_v27 }
  0xea   :  { %1282 = vmatprep.mubr.msk.f32.mxu0 %vm87_vm1, %v581_v29 }
  0xec   :  { %v320_v53 = vpop.trf.xlu0  ;;  %v823_v56 = vpop.trf.xlu1 }
  0xed   :  { %1251 = vmatmul.mubr.msk.f32.gmra.mxu1 %vm87_vm1, %v320_v53  ;;  %1283 = vmatmul.mubr.msk.f32.gmra.mxu0 %vm87_vm1, %v582_v31 }
  0xee   :  { %1285 = vmatprep.mubr.msk.f32.mxu0 %vm87_vm1, %v583_v33 }
  0xf0   :  { %v321_v55 = vpop.trf.xlu0  ;;  %v824_v59 = vpop.trf.xlu1 }
  0xf1   :  { %1253 = vmatprep.mubr.msk.f32.mxu1 %vm87_vm1, %v321_v55  ;;  %1286 = vmatmul.mubr.msk.f32.gmra.mxu0 %vm87_vm1, %v584_v35 }
  0xf2   :  { %1288 = vmatprep.mubr.msk.f32.mxu0 %vm87_vm1, %v585_v37 }
  0xf4   :  { %v322_v57 = vpop.trf.xlu0  ;;  %v825_v61 = vpop.trf.xlu1 }
  0xf5   :  { %1254 = vmatmul.mubr.msk.f32.gmra.mxu1 %vm87_vm1, %v322_v57  ;;  %1289 = vmatmul.mubr.msk.f32.gmra.mxu0 %vm87_vm1, %v586_v39 }
  0xf6   :  { %1291 = vmatprep.mubr.msk.f32.mxu0 %vm87_vm1, %v587_v41 }
  0xf8   :  { %v323_v58 = vpop.trf.xlu0  ;;  %v826_v0 = vpop.trf.xlu1 }
  0xf9   :  { %1256 = vmatprep.mubr.msk.f32.mxu1 %vm87_vm1, %v323_v58  ;;  %1292 = vmatmul.mubr.msk.f32.gmra.mxu0 %vm87_vm1, %v588_v43 }
  0xfa   :  { %1294 = vmatprep.mubr.msk.f32.mxu0 %vm87_vm1, %v589_v45 }
  0xfc   :  { %v324_v60 = vpop.trf.xlu0  ;;  %v827_v2 = vpop.trf.xlu1 }
  0xfd   :  { %1257 = vmatmul.mubr.msk.f32.gmra.mxu1 %vm87_vm1, %v324_v60  ;;  %1295 = vmatmul.mubr.msk.f32.gmra.mxu0 %vm87_vm1, %v590_v47 }
 0x100   :  { %v325_v62 = vpop.trf.xlu0  ;;  %v828_v5 = vpop.trf.xlu1 }
 0x101   :  { %1259 = vmatprep.mubr.msk.f32.mxu1 %vm87_vm1, %v325_v62 }
 0x104   :  { %v326_v63 = vpop.trf.xlu0  ;;  %v829_v7 = vpop.trf.xlu1 }
 0x105   :  { %1260 = vmatmul.mubr.msk.f32.gmra.mxu1 %vm87_vm1, %v326_v63 }
 0x108   :  { %v327_v1 = vpop.trf.xlu0  ;;  %v830_v10 = vpop.trf.xlu1 }
 0x109   :  { %1262 = vmatprep.mubr.msk.f32.mxu1 %vm87_vm1, %v327_v1 }
 0x10c   :  { %v328_v3 = vpop.trf.xlu0  ;;  %v831_v11 = vpop.trf.xlu1 }
 0x10d   :  { %1263 = vmatmul.mubr.msk.f32.gmra.mxu1 %vm87_vm1, %v328_v3 }
 0x110   :  { %v329_v4 = vpop.trf.xlu0  ;;  %v832_v12 = vpop.trf.xlu1 }
 0x111   :  { %1265 = vmatprep.mubr.msk.f32.mxu1 %vm87_vm1, %v329_v4 }
 0x114   :  { %v330_v6 = vpop.trf.xlu0  ;;  %v833_v13 = vpop.trf.xlu1 }
 0x115   :  { %1266 = vmatmul.mubr.msk.f32.gmra.mxu1 %vm87_vm1, %v330_v6 }
 0x118   :  { %v331_v8 = vpop.trf.xlu0  ;;  %v834_v14 = vpop.trf.xlu1 }
 0x119   :  { %1268 = vmatprep.mubr.msk.f32.mxu1 %vm87_vm1, %v331_v8 }
 0x11c   :  { %v332_v9 = vpop.trf.xlu0  ;;  %v835_v15 = vpop.trf.xlu1 }
 0x11d   :  { %1269 = vmatmul.mubr.msk.f32.gmra.mxu1 %vm87_vm1, %v332_v9 }
 0x11e   :  { %1299 = vmatprep.mubr.msk.f32.mxu1 %vm87_vm1, %v820_v49 }
 0x121   :  { %1300 = vmatmul.mubr.msk.f32.vlgmr.msra.gmra.mxu1 %vm87_vm1, %v821_v51 }
 0x122   :  { %1302 = vmatprep.mubr.msk.f32.mxu1 %vm87_vm1, %v822_v54 }
 0x125   :  { %1303 = vmatmul.mubr.msk.f32.gmra.mxu1 %vm87_vm1, %v823_v56 }
 0x126   :  { %1305 = vmatprep.mubr.msk.f32.mxu1 %vm87_vm1, %v824_v59 }
 0x129   :  { %1306 = vmatmul.mubr.msk.f32.gmra.mxu1 %vm87_vm1, %v825_v61 }
 0x12a   :  { %1308 = vmatprep.mubr.msk.f32.mxu1 %vm87_vm1, %v826_v0 }
 0x12d   :  { %1309 = vmatmul.mubr.msk.f32.gmra.mxu1 %vm87_vm1, %v827_v2 }
 0x12e   :  { %1311 = vmatprep.mubr.msk.f32.mxu1 %vm87_vm1, %v828_v5 }
 0x131   :  { %1312 = vmatmul.mubr.msk.f32.gmra.mxu1 %vm87_vm1, %v829_v7 }
 0x132   :  { %1314 = vmatprep.mubr.msk.f32.mxu1 %vm87_vm1, %v830_v10 }
 0x135   :  { %1315 = vmatmul.mubr.msk.f32.gmra.mxu1 %vm87_vm1, %v831_v11 }
 0x136   :  { %1317 = vmatprep.mubr.msk.f32.mxu1 %vm87_vm1, %v832_v12 }
 0x139   :  { %1318 = vmatmul.mubr.msk.f32.gmra.mxu1 %vm87_vm1, %v833_v13 }
 0x13a   :  { %1320 = vmatprep.mubr.msk.f32.mxu1 %vm87_vm1, %v834_v14 }
 0x13d   :  { %1321 = vmatmul.mubr.msk.f32.gmra.mxu1 %vm87_vm1, %v835_v15 }
 0x165   :  { %v1223_v16 = vpop.f32.mrf.mxu0 }
 0x166   :  { %286 = vst [vmem:[#allocation7 + $0x8] sm:$0xff] %v1223_v16 }
 0x167   :  { %v206_v17 = vpop.f32.mrf.mxu0 }
 0x168   :  { %285 = vst [vmem:[#allocation7] sm:$0xff] %v206_v17 }
 0x16d   :  { %v1226_v18 = vpop.f32.mrf.mxu0 }
 0x16e   :  { %288 = vst [vmem:[#allocation7 + $0x18] sm:$0xff] %v1226_v18 }
 0x16f   :  { %v216_v19 = vpop.f32.mrf.mxu0 }
 0x170   :  { %287 = vst [vmem:[#allocation7 + $0x10] sm:$0xff] %v216_v19 }
 0x175   :  { %v1229_v20 = vpop.f32.mrf.mxu0 }
 0x176   :  { %290 = vst [vmem:[#allocation7 + $0x28] sm:$0xff] %v1229_v20 }
 0x177   :  { %v226_v21 = vpop.f32.mrf.mxu0 }
 0x178   :  { %289 = vst [vmem:[#allocation7 + $0x20] sm:$0xff] %v226_v21 }
 0x17d   :  { %v1232_v22 = vpop.f32.mrf.mxu0 }
 0x17e   :  { %292 = vst [vmem:[#allocation7 + $0x38] sm:$0xff] %v1232_v22 }
 0x17f   :  { %v236_v23 = vpop.f32.mrf.mxu0 }
 0x180   :  { %291 = vst [vmem:[#allocation7 + $0x30] sm:$0xff] %v236_v23 }
 0x185   :  { %v1235_v24 = vpop.f32.mrf.mxu0 }
 0x186   :  { %294 = vst [vmem:[#allocation7 + $0x48] sm:$0xff] %v1235_v24 }
 0x187   :  { %v246_v25 = vpop.f32.mrf.mxu0 }
 0x188   :  { %293 = vst [vmem:[#allocation7 + $0x40] sm:$0xff] %v246_v25 }
 0x18d   :  { %v1238_v26 = vpop.f32.mrf.mxu0 }
 0x18e   :  { %296 = vst [vmem:[#allocation7 + $0x58] sm:$0xff] %v1238_v26 }
 0x18f   :  { %v256_v27 = vpop.f32.mrf.mxu0 }
 0x190   :  { %295 = vst [vmem:[#allocation7 + $0x50] sm:$0xff] %v256_v27 }
 0x195   :  { %v1241_v28 = vpop.f32.mrf.mxu0 }
 0x196   :  { %298 = vst [vmem:[#allocation7 + $0x68] sm:$0xff] %v1241_v28 }
 0x197   :  { %v266_v29 = vpop.f32.mrf.mxu0 }
 0x198   :  { %297 = vst [vmem:[#allocation7 + $0x60] sm:$0xff] %v266_v29 }
 0x19d   :  { %v1244_v30 = vpop.f32.mrf.mxu0 }
 0x19e   :  { %300 = vst [vmem:[#allocation7 + $0x78] sm:$0xff] %v1244_v30 }
 0x19f   :  { %v276_v31 = vpop.f32.mrf.mxu0 }
 0x1a0   :  { %299 = vst [vmem:[#allocation7 + $0x70] sm:$0xff] %v276_v31 }
 0x1a1   :  { %v1275_v32 = vpop.f32.mrf.mxu0 }
 0x1a2   :  { %789 = vst [vmem:[#allocation7 + $0x88] sm:$0xff] %v1275_v32 }
 0x1a3   :  { %v708_v33 = vpop.f32.mrf.mxu0 }
 0x1a4   :  { %788 = vst [vmem:[#allocation7 + $0x80] sm:$0xff] %v708_v33 }
 0x1a5   :  { %v1249_v34 = vpop.f32.mrf.mxu1  ;;  %v1278_v35 = vpop.f32.mrf.mxu0 }
 0x1a6   :  { %530 = vst [vmem:[#allocation8 + $0x8] sm:$0xff] %v1249_v34  ;;  %791 = vst [vmem:[#allocation7 + $0x98] sm:$0xff] %v1278_v35 }
 0x1a7   :  { %v450_v36 = vpop.f32.mrf.mxu1  ;;  %v718_v37 = vpop.f32.mrf.mxu0 }
 0x1a8   :  { %529 = vst [vmem:[#allocation8] sm:$0xff] %v450_v36  ;;  %790 = vst [vmem:[#allocation7 + $0x90] sm:$0xff] %v718_v37 }
 0x1a9   :  { %v1281_v38 = vpop.f32.mrf.mxu0 }
 0x1aa   :  { %793 = vst [vmem:[#allocation7 + $0xa8] sm:$0xff] %v1281_v38 }
 0x1ab   :  { %v728_v39 = vpop.f32.mrf.mxu0 }
 0x1ac   :  { %792 = vst [vmem:[#allocation7 + $0xa0] sm:$0xff] %v728_v39 }
 0x1ad   :  { %v1252_v40 = vpop.f32.mrf.mxu1  ;;  %v1284_v41 = vpop.f32.mrf.mxu0 }
 0x1ae   :  { %532 = vst [vmem:[#allocation8 + $0x18] sm:$0xff] %v1252_v40  ;;  %795 = vst [vmem:[#allocation7 + $0xb8] sm:$0xff] %v1284_v41 }
 0x1af   :  { %v460_v42 = vpop.f32.mrf.mxu1  ;;  %v738_v43 = vpop.f32.mrf.mxu0 }
 0x1b0   :  { %531 = vst [vmem:[#allocation8 + $0x10] sm:$0xff] %v460_v42  ;;  %794 = vst [vmem:[#allocation7 + $0xb0] sm:$0xff] %v738_v43 }
 0x1b1   :  { %v1287_v44 = vpop.f32.mrf.mxu0 }
 0x1b2   :  { %797 = vst [vmem:[#allocation7 + $0xc8] sm:$0xff] %v1287_v44 }
 0x1b3   :  { %v748_v45 = vpop.f32.mrf.mxu0 }
 0x1b4   :  { %796 = vst [vmem:[#allocation7 + $0xc0] sm:$0xff] %v748_v45 }
 0x1b5   :  { %v1255_v46 = vpop.f32.mrf.mxu1  ;;  %v1290_v47 = vpop.f32.mrf.mxu0 }
 0x1b6   :  { %534 = vst [vmem:[#allocation8 + $0x28] sm:$0xff] %v1255_v46  ;;  %799 = vst [vmem:[#allocation7 + $0xd8] sm:$0xff] %v1290_v47 }
 0x1b7   :  { %v470_v48 = vpop.f32.mrf.mxu1  ;;  %v758_v49 = vpop.f32.mrf.mxu0 }
 0x1b8   :  { %533 = vst [vmem:[#allocation8 + $0x20] sm:$0xff] %v470_v48  ;;  %798 = vst [vmem:[#allocation7 + $0xd0] sm:$0xff] %v758_v49 }
 0x1b9   :  { %v1293_v50 = vpop.f32.mrf.mxu0 }
 0x1ba   :  { %801 = vst [vmem:[#allocation7 + $0xe8] sm:$0xff] %v1293_v50 }
 0x1bb   :  { %v768_v51 = vpop.f32.mrf.mxu0 }
 0x1bc   :  { %800 = vst [vmem:[#allocation7 + $0xe0] sm:$0xff] %v768_v51 }
 0x1bd   :  { %v1258_v52 = vpop.f32.mrf.mxu1  ;;  %v1296_v53 = vpop.f32.mrf.mxu0 }
 0x1be   :  { %536 = vst [vmem:[#allocation8 + $0x38] sm:$0xff] %v1258_v52  ;;  %803 = vst [vmem:[#allocation7 + $0xf8] sm:$0xff] %v1296_v53 }
 0x1bf   :  { %v480_v54 = vpop.f32.mrf.mxu1  ;;  %v778_v55 = vpop.f32.mrf.mxu0 }
 0x1c0   :  { %535 = vst [vmem:[#allocation8 + $0x30] sm:$0xff] %v480_v54  ;;  %802 = vst [vmem:[#allocation7 + $0xf0] sm:$0xff] %v778_v55 }
 0x1c1   :  { %1383 = shalt.err (!%p1380_p0)
}
 0x1c2   :  { %s1425_s25 = smov 128   ;;  %s1426_s26 = smov 8  }
 0x1c3   :  { %1060 = dma.vmem_to_hbm [thread:$0]  %s1055_s1, 4096, %s1545_s2, [#allocation4], %s1425_s25, %s1425_s25, %s1426_s26  }
 0x1c4   :  { %s1427_s2 = smov [#allocation8]  }
 0x1c5   :  { %v1261_v56 = vpop.f32.mrf.mxu1  ;;  %s1066_s29 = sshll.u32 %s1427_s2, 4  ;;  %s1067_s29 = int_to_ptr.vmem [resolvable:$true] %s1066_s29 }
 0x1c6   :  { %538 = vst [vmem:[#allocation8 + $0x48] sm:$0xff] %v1261_v56  ;;  %s1392_s30 = scalar_lea.vmem %s1067_s29, 4096  ;;  %p1397_p2 = scmp.lt.s32.totalorder %s1067_s29, %s1067_s29 }
 0x1c7   :  { %v490_v57 = vpop.f32.mrf.mxu1  ;;  %p1393_p1 = scmp.ne.s32.totalorder %s1067_s29, %s1392_s30  ;;  %p1398_p3 = scmp.lt.s32.totalorder %s1392_s30, %s1392_s30 }
 0x1c8   :  { %537 = vst [vmem:[#allocation8 + $0x40] sm:$0xff] %v490_v57 }
 0x1c9   :  { %p1399_p4 = por %p1398_p3, %p1397_p2 }
 0x1cb   :  { %p1400_p5 = pnand %p1399_p4, %p1393_p1 }
 0x1cd   :  { %v1264_v58 = vpop.f32.mrf.mxu1 }
 0x1ce   :  { %540 = vst [vmem:[#allocation8 + $0x58] sm:$0xff] %v1264_v58 }
 0x1cf   :  { %v500_v59 = vpop.f32.mrf.mxu1 }
 0x1d0   :  { %539 = vst [vmem:[#allocation8 + $0x50] sm:$0xff] %v500_v59 }
 0x1d5   :  { %v1267_v60 = vpop.f32.mrf.mxu1 }
 0x1d6   :  { %542 = vst [vmem:[#allocation8 + $0x68] sm:$0xff] %v1267_v60 }
 0x1d7   :  { %v510_v61 = vpop.f32.mrf.mxu1 }
 0x1d8   :  { %541 = vst [vmem:[#allocation8 + $0x60] sm:$0xff] %v510_v61 }
 0x1dd   :  { %v1270_v62 = vpop.f32.mrf.mxu1 }
 0x1de   :  { %544 = vst [vmem:[#allocation8 + $0x78] sm:$0xff] %v1270_v62 }
 0x1df   :  { %v520_v63 = vpop.f32.mrf.mxu1 }
 0x1e0   :  { %543 = vst [vmem:[#allocation8 + $0x70] sm:$0xff] %v520_v63 }
 0x1e1   :  { %v1301_v0 = vpop.f32.mrf.mxu1 }
 0x1e2   :  { %1034 = vst [vmem:[#allocation8 + $0x88] sm:$0xff] %v1301_v0 }
 0x1e3   :  { %v953_v1 = vpop.f32.mrf.mxu1 }
 0x1e4   :  { %1033 = vst [vmem:[#allocation8 + $0x80] sm:$0xff] %v953_v1 }
 0x1e5   :  { %v1304_v2 = vpop.f32.mrf.mxu1 }
 0x1e6   :  { %1036 = vst [vmem:[#allocation8 + $0x98] sm:$0xff] %v1304_v2 }
 0x1e7   :  { %v963_v3 = vpop.f32.mrf.mxu1 }
 0x1e8   :  { %1035 = vst [vmem:[#allocation8 + $0x90] sm:$0xff] %v963_v3 }
 0x1e9   :  { %v1307_v4 = vpop.f32.mrf.mxu1 }
 0x1ea   :  { %1038 = vst [vmem:[#allocation8 + $0xa8] sm:$0xff] %v1307_v4 }
 0x1eb   :  { %v973_v5 = vpop.f32.mrf.mxu1 }
 0x1ec   :  { %1037 = vst [vmem:[#allocation8 + $0xa0] sm:$0xff] %v973_v5 }
 0x1ed   :  { %v1310_v6 = vpop.f32.mrf.mxu1 }
 0x1ee   :  { %1040 = vst [vmem:[#allocation8 + $0xb8] sm:$0xff] %v1310_v6 }
 0x1ef   :  { %v983_v7 = vpop.f32.mrf.mxu1 }
 0x1f0   :  { %1039 = vst [vmem:[#allocation8 + $0xb0] sm:$0xff] %v983_v7 }
 0x1f1   :  { %v1313_v8 = vpop.f32.mrf.mxu1 }
 0x1f2   :  { %1042 = vst [vmem:[#allocation8 + $0xc8] sm:$0xff] %v1313_v8 }
 0x1f3   :  { %v993_v9 = vpop.f32.mrf.mxu1 }
 0x1f4   :  { %1041 = vst [vmem:[#allocation8 + $0xc0] sm:$0xff] %v993_v9 }
 0x1f5   :  { %v1316_v10 = vpop.f32.mrf.mxu1 }
 0x1f6   :  { %1044 = vst [vmem:[#allocation8 + $0xd8] sm:$0xff] %v1316_v10 }
 0x1f7   :  { %v1003_v11 = vpop.f32.mrf.mxu1 }
 0x1f8   :  { %1043 = vst [vmem:[#allocation8 + $0xd0] sm:$0xff] %v1003_v11 }
 0x1f9   :  { %v1319_v12 = vpop.f32.mrf.mxu1 }
 0x1fa   :  { %1046 = vst [vmem:[#allocation8 + $0xe8] sm:$0xff] %v1319_v12 }
 0x1fb   :  { %v1013_v13 = vpop.f32.mrf.mxu1 }
 0x1fc   :  { %1045 = vst [vmem:[#allocation8 + $0xe0] sm:$0xff] %v1013_v13 }
 0x1fd   :  { %v1322_v14 = vpop.f32.mrf.mxu1 }
 0x1fe   :  { %1048 = vst [vmem:[#allocation8 + $0xf8] sm:$0xff] %v1322_v14 }
 0x1ff   :  { %v1023_v15 = vpop.f32.mrf.mxu1 }
 0x200   :  { %1047 = vst [vmem:[#allocation8 + $0xf0] sm:$0xff] %v1023_v15 }
 0x201   :  { %1403 = shalt.err (!%p1400_p5)
}
 0x202   :  { %1072 = dma.vmem_to_hbm [thread:$0]  %s1067_s29, 4096, %s1546_s3, [#allocation9], %s1425_s25, %s1425_s25, %s1426_s26  }
 0x203   :  { %1416 = dma.done.wait [#allocation4], 4096  }
 0x204   :  { %1417 = vsyncadd [#allocation4], 4294963200 }
 0x205   :  { %1418 = dma.done.wait [#allocation9], 4096  }
 0x206   :  { %1419 = vsyncadd [#allocation9], 4294963200 }
 0x207   :  { %1079 = vsyncpa [#allocation3], 1 }
 0x208   :  { %1080 = vsyncpa [#allocation6], 1 }
 0x209   :  { %1081 = vsyncpa [#allocation4], 1 }
 0x20a   :  { %1082 = vsyncpa [#allocation9], 1 }

</bundles_post_ra>
